<compile_context>
chip_gen: v5e
topology: v5e:2x2
jax: 0.10.0
libtpu: 0.0.40
codegen_flags: <defaults>
</compile_context>

<pallas_src>
import functools

import jax
import jax.numpy as jnp
from jax.experimental import pallas as pl
from jax.experimental.pallas import tpu as pltpu


# --------------------------------------------------------------------------- #
# Helpers
# --------------------------------------------------------------------------- #
def _cdiv(a, b):
    return -(-a // b)


def _round_up(x, m):
    return _cdiv(x, m) * m


def _vmem_capacity_bytes():
    try:
        info = pltpu.get_tpu_info()
        for name in ("vmem_capacity_bytes", "vmem_size_bytes", "vmem_bytes"):
            v = getattr(info, name, None)
            if v:
                return int(v)
    except Exception:
        pass
    return 64 * 1024 * 1024            # conservative fallback (v7x physical)


def _padded_rows(rows, itemsize):
    """Rows padded to the native sublane tile (8 f32 / 16 bf16 / 32 i8)."""
    unit = 8 * max(1, 4 // itemsize)
    return _round_up(rows, unit)


def _double_buffered_bytes(tile_n, tile_d, itemsizes):
    """VMEM footprint of the double-buffered input windows (both inputs)."""
    return sum(2 * _padded_rows(tile_n, it) * tile_d * it for it in itemsizes)


def _pick_tiles(n, d, itemsizes, tile_n=None, tile_d=None, vmem_cap=None):
    """Pick (tile_n, tile_d) for the (N, D) streaming reduction."""
    if vmem_cap is None:
        vmem_cap = _vmem_capacity_bytes()

    # Sublane multiple legal for every input dtype.
    sub = 8 * max(1, 4 // min(itemsizes))
    max_item = max(itemsizes)

    # Generation-aware per-input block byte target (amortize ~0.35 us / step):
    #   v7x-class (<=96 MiB VMEM, ~3.2 TB/s HBM) -> 8 MiB  (~5 us of HBM/step)
    #   v5e / v6e (128 MiB VMEM)                 -> 4 MiB
    target = (8 if vmem_cap <= 96 * 1024 * 1024 else 4) * 1024 * 1024
    buf_budget = min(vmem_cap // 2, 48 * 1024 * 1024)

    auto_n = tile_n is None
    auto_d = tile_d is None

    # ---- validate / round user-supplied tiles ------------------------------
    if not auto_n:
        tile_n = max(1, min(int(tile_n), n))
        if tile_n != n:
            tile_n = min(max(sub, tile_n // sub * sub), n)
    if not auto_d:
        tile_d = max(1, min(int(tile_d), d))
        if tile_d != d:
            tile_d = min(max(128, tile_d // 128 * 128), d)

    # ---- automatic batch tile: start at the minimum legal size -------------
    if auto_n:
        tile_n = n if n <= sub else sub

    # ---- automatic D tile: widest tile within budget, capped at target -----
    if auto_d:
        bytes_per_col = _double_buffered_bytes(tile_n, 1, itemsizes)
        cap_cols = buf_budget // max(1, bytes_per_col)
        want_cols = _cdiv(target, max(1, tile_n * max_item))
        cols = max(128, min(cap_cols, want_cols) // 128 * 128)
        tile_d = d if cols >= d else cols

    # ---- grow the batch tile when the whole row fits in one D block --------
    if auto_n and tile_d >= d and n > tile_n:
        want_rows = _cdiv(target, max(1, d * max_item))
        cap_rows = buf_budget // max(1, 2 * d * sum(itemsizes))
        rows = max(tile_n, min(want_rows, cap_rows) // sub * sub)
        tile_n = n if rows >= n else rows

    # ---- single batch block: cap the D tile so a second (parallel) D split
    #      exists to feed v7x's second TensorCore ----------------------------
    if auto_d and tile_n >= n and tile_d >= d and d >= 256:
        tile_d = _round_up((d + 1) // 2, 128)

    return tile_n, tile_d


# --------------------------------------------------------------------------- #
# Kernel
# --------------------------------------------------------------------------- #
def _tversky_sums_kernel(logits_ref, target_ref, spt_ref, sp_ref, st_ref,
                         *, ignore_index, d_valid, tile_d,
                         d_blocks_per_split, may_need_mask):
    """Accumulates S_pt / S_p / S_t per (split, batch-block) output column."""
    c = pl.program_id(0)          # D-split (core) index
    j = pl.program_id(2)          # D-block index within this split (innermost)

    @pl.when(j == 0)
    def _():
        spt_ref[...] = jnp.zeros_like(spt_ref)
        sp_ref[...] = jnp.zeros_like(sp_ref)
        st_ref[...] = jnp.zeros_like(st_ref)

    logits = logits_ref[...].astype(jnp.float32)
    target = target_ref[...].astype(jnp.float32)

    if ignore_index is not None:
        # Same semantics as the PyTorch module: zero the *raw* logits of
        # ignored pixels (sigmoid(0) = 0.5 still lands in P_NG).
        valid = target != float(ignore_index)
        logits = jnp.where(valid, logits, 0.0)
        target = jnp.where(valid, target, 0.0)

    # sigmoid(x) = 0.5 * tanh(0.5 * x) + 0.5  -- single EUP op, no VALU divide.
    probs = 0.5 * jnp.tanh(0.5 * logits) + 0.5

    def accumulate(p, t):
        spt_ref[0] += jnp.sum(p * t, axis=1, keepdims=True)
        sp_ref[0] += jnp.sum(p, axis=1, keepdims=True)
        st_ref[0] += jnp.sum(t, axis=1, keepdims=True)

    if may_need_mask:
        gblk = c * d_blocks_per_split + j           # global D-block index
        tail = (gblk + 1) * tile_d > d_valid        # ragged / overrun tile

        @pl.when(jnp.logical_not(tail))
        def _():
            accumulate(probs, target)

        @pl.when(tail)
        def _():
            col = gblk * tile_d + jax.lax.broadcasted_iota(
                jnp.int32, probs.shape, 1)
            in_range = col < d_valid
            accumulate(jnp.where(in_range, probs, 0.0),
                       jnp.where(in_range, target, 0.0))
    else:
        accumulate(probs, target)


# --------------------------------------------------------------------------- #
# Wrapper
# --------------------------------------------------------------------------- #
def binary_tversky_loss_v2(logits, target, *, alpha=0.3, beta=0.7,
                           ignore_index=None, reduction='mean',
                           tile_n=None, tile_d=None):
    """Forward pass of BinaryTverskyLossV2 with the hot reduction in Pallas."""
    epsilon = 1e-06
    s = beta + alpha
    if s != 1:
        beta = beta / s
        alpha = alpha / s

    n = logits.shape[0]
    # Flatten exactly like torch .view(batch_size, -1); keep native dtypes —
    # the f32 cast happens inside the kernel so no f32 copies hit HBM.
    logits2d = logits.reshape(n, -1)
    target2d = target.reshape(n, -1)
    d = logits2d.shape[1]

    itemsizes = (logits2d.dtype.itemsize, target2d.dtype.itemsize)
    vmem_cap = _vmem_capacity_bytes()
    tile_n, tile_d = _pick_tiles(n, d, itemsizes, tile_n=tile_n,
                                 tile_d=tile_d, vmem_cap=vmem_cap)

    n_blocks = _cdiv(n, tile_n)
    d_blocks = _cdiv(d, tile_d)
    # v7x dual-TensorCore: if the batch axis has a single block, split the D
    # range across a leading parallel axis of size 2 (no-op on 1-TC chips).
    n_splits = 2 if (n_blocks == 1 and d_blocks >= 2) else 1
    dbs = _cdiv(d_blocks, n_splits)
    may_need_mask = (d % tile_d != 0) or (n_splits * dbs != d_blocks)

    kernel = functools.partial(
        _tversky_sums_kernel, ignore_index=ignore_index, d_valid=d,
        tile_d=tile_d, d_blocks_per_split=dbs, may_need_mask=may_need_mask)

    if n_splits * dbs == d_blocks:
        def in_map(c, i, j):
            return (i, c * dbs + j)
    else:
        # Last split may run past the end; clamp the block index (the kernel's
        # tail mask zeroes any re-read garbage).
        def in_map(c, i, j):
            return (i, jnp.minimum(c * dbs + j, d_blocks - 1))

    def out_map(c, i, j):
        return (c, i, 0)

    # VMEM limit derived from the actual tiles (+25% headroom + outputs).
    in_bufs = _double_buffered_bytes(tile_n, tile_d, itemsizes)
    out_bufs = 3 * 2 * _round_up(tile_n, 8) * 128 * 4
    vmem_limit = int(in_bufs * 1.25) + out_bufs + (2 << 20)
    vmem_limit = max(8 << 20, min(vmem_limit, vmem_cap))

    sums_shape = jax.ShapeDtypeStruct((n_splits, n, 1), jnp.float32)

    spt, sp, st = pl.pallas_call(
        kernel,
        out_shape=(sums_shape, sums_shape, sums_shape),
        grid_spec=pltpu.PrefetchScalarGridSpec(
            num_scalar_prefetch=0,
            grid=(n_splits, n_blocks, dbs),
            in_specs=[
                pl.BlockSpec((tile_n, tile_d), in_map),
                pl.BlockSpec((tile_n, tile_d), in_map),
            ],
            out_specs=[
                pl.BlockSpec((1, tile_n, 1), out_map),
                pl.BlockSpec((1, tile_n, 1), out_map),
                pl.BlockSpec((1, tile_n, 1), out_map),
            ],
        ),
        compiler_params=pltpu.CompilerParams(
            dimension_semantics=("parallel", "parallel", "arbitrary"),
            vmem_limit_bytes=vmem_limit),
    )(logits2d, target2d)

    # Tiny epilogue in plain JAX: combine per-split partial sums and form the
    # Tversky index exactly as the reference module does.
    p_g = jnp.sum(spt, axis=(0, 2))
    s_p = jnp.sum(sp, axis=(0, 2))
    s_t = jnp.sum(st, axis=(0, 2))
    p_ng = s_p - p_g               # == sum(p * (1 - t))
    np_g = s_t - p_g               # == sum((1 - p) * t)
    loss = 1.0 - p_g / (p_g + alpha * p_ng + beta * np_g + epsilon)

    if reduction == 'none':
        return loss
    elif reduction == 'sum':
        return jnp.sum(loss)
    else:  # 'mean' (module default)
        return jnp.mean(loss)


# --------------------------------------------------------------------------- #
# Pure-JAX reference (mirrors the PyTorch module)
# --------------------------------------------------------------------------- #
def _reference(logits, target, alpha=0.3, beta=0.7, ignore_index=None,
               reduction='mean'):
    eps = 1e-06
    s = beta + alpha
    if s != 1:
        beta, alpha = beta / s, alpha / s
    n = logits.shape[0]
    logits = logits.astype(jnp.float32)
    target = target.astype(jnp.float32)
    if ignore_index is not None:
        valid = (target != ignore_index).astype(jnp.float32)
        logits = logits * valid
        target = target * valid
    probs = jax.nn.sigmoid(logits.reshape(n, -1))
    tgt = target.reshape(n, -1)
    pg = jnp.sum(probs * tgt, 1)
    png = jnp.sum(probs * (1 - tgt), 1)
    npg = jnp.sum((1 - probs) * tgt, 1)
    ti = pg / (pg + alpha * png + beta * npg + eps)
    loss = 1.0 - ti
    if reduction == 'none':
        return loss
    if reduction == 'sum':
        return jnp.sum(loss)
    return jnp.mean(loss)


if __name__ == "__main__":
    key = jax.random.PRNGKey(0)
    k1, k2, k3, k4, k5, k6, k7, k8 = jax.random.split(key, 8)

    # Test 1: canonical module shape [N, 1, H, W], auto tiling, mean reduction.
    # (small batch -> exercises the D-split / dual-core path)
    N, C, H, W = 2, 1, 16, 16
    logits = jax.random.normal(k1, (N, C, H, W), dtype=jnp.float32)
    target = (jax.random.uniform(k2, (N, C, H, W)) > 0.5).astype(jnp.float32)
    loss = jax.block_until_ready(
        binary_tversky_loss_v2(logits, target, alpha=0.3, beta=0.7,
                               reduction='mean'))
    ref = _reference(logits, target, alpha=0.3, beta=0.7, reduction='mean')
    assert jnp.allclose(loss, ref, atol=1e-5, rtol=1e-5), (loss, ref)

    # Test 2: ragged last D tile (D=300, tile_d=128) + D-split overrun,
    # ignore_index fused in-kernel, reduction='none'.
    N2, C2, H2, W2 = 2, 1, 10, 30
    logits2 = jax.random.normal(k3, (N2, C2, H2, W2), dtype=jnp.float32)
    t2 = jax.random.uniform(k4, (N2, C2, H2, W2))
    target2 = jnp.where(t2 > 0.66, 1.0, jnp.where(t2 < 0.33, 0.0, 255.0))
    loss2 = jax.block_until_ready(
        binary_tversky_loss_v2(logits2, target2, alpha=0.3, beta=0.7,
                               ignore_index=255, reduction='none',
                               tile_d=128))
    ref2 = _reference(logits2, target2, alpha=0.3, beta=0.7,
                      ignore_index=255, reduction='none')
    assert jnp.allclose(loss2, ref2, atol=1e-5, rtol=1e-5), (loss2, ref2)

    # Test 3: ragged batch block (N=10, tile_n=8) + multi-tile D, sum reduction.
    N3, C3, H3, W3 = 10, 1, 20, 20
    logits3 = jax.random.normal(k5, (N3, C3, H3, W3), dtype=jnp.float32)
    target3 = (jax.random.uniform(k6, (N3, C3, H3, W3)) > 0.5).astype(jnp.float32)
    loss3 = jax.block_until_ready(
        binary_tversky_loss_v2(logits3, target3, alpha=0.3, beta=0.7,
                               reduction='sum', tile_n=8, tile_d=128))
    ref3 = _reference(logits3, target3, alpha=0.3, beta=0.7, reduction='sum')
    assert jnp.allclose(loss3, ref3, atol=1e-4, rtol=1e-5), (loss3, ref3)

    # Test 4: mixed dtypes (bf16 logits, f32 target), auto tiling.
    N4, C4, H4, W4 = 4, 1, 16, 16
    logits4 = jax.random.normal(k7, (N4, C4, H4, W4), dtype=jnp.bfloat16)
    target4 = (jax.random.uniform(k8, (N4, C4, H4, W4)) > 0.5).astype(jnp.float32)
    loss4 = jax.block_until_ready(
        binary_tversky_loss_v2(logits4, target4, alpha=0.3, beta=0.7,
                               reduction='mean'))
    ref4 = _reference(logits4, target4, alpha=0.3, beta=0.7, reduction='mean')
    assert jnp.allclose(loss4, ref4, atol=1e-5, rtol=1e-5), (loss4, ref4)

    print("KERNEL_OK")
</pallas_src>

<mosaic_0001>
module attributes {stable_mosaic.version = 11 : i64} {
  func.func @_tversky_sums_kernel(%arg0: i32, %arg1: i32, %arg2: i32, %arg3: memref<2x128xf32, #tpu.memory_space<vmem>>, %arg4: memref<2x128xf32, #tpu.memory_space<vmem>>, %arg5: memref<1x2x1xf32, #tpu.memory_space<vmem>>, %arg6: memref<1x2x1xf32, #tpu.memory_space<vmem>>, %arg7: memref<1x2x1xf32, #tpu.memory_space<vmem>>) attributes {dimension_semantics = [#tpu.dimension_semantics<parallel>, #tpu.dimension_semantics<parallel>, #tpu.dimension_semantics<arbitrary>], iteration_bounds = array<i64: 2, 1, 1>, scalar_prefetch = 0 : i64, scratch_operands = 0 : i64, tpu.core_type = #tpu.core_type<tc>, window_params = [{transform_indices = @transform_0, window_bounds = array<i64: 2, 128>}, {transform_indices = @transform_1, window_bounds = array<i64: 2, 128>}, {transform_indices = @transform_2, window_bounds = array<i64: 1, 2, 1>}, {transform_indices = @transform_3, window_bounds = array<i64: 1, 2, 1>}, {transform_indices = @transform_4, window_bounds = array<i64: 1, 2, 1>}]} {
    %c0_i32 = arith.constant 0 : i32
    %0 = arith.cmpi eq, %arg2, %c0_i32 : i32
    %1 = arith.extui %0 : i1 to i32
    %c0_i32_0 = arith.constant 0 : i32
    %2 = arith.cmpi ne, %1, %c0_i32_0 : i32
    scf.if %2 {
      %cst_27 = arith.constant 0.000000e+00 : f32
      %37 = vector.broadcast %cst_27 : f32 to vector<1x2x1xf32>
      %c0_28 = arith.constant 0 : index
      %c0_29 = arith.constant 0 : index
      %c0_30 = arith.constant 0 : index
      %38 = vector.load %arg5[%c0_28, %c0_29, %c0_30] : memref<1x2x1xf32, #tpu.memory_space<vmem>>, vector<1x2x1xf32>
      tpu.vector_store %arg5[%c0_28, %c0_29, %c0_30], %37 {strides = array<i32>} : memref<1x2x1xf32, #tpu.memory_space<vmem>>, vector<1x2x1xf32>,
      %cst_31 = arith.constant 0.000000e+00 : f32
      %39 = vector.broadcast %cst_31 : f32 to vector<1x2x1xf32>
      %c0_32 = arith.constant 0 : index
      %c0_33 = arith.constant 0 : index
      %c0_34 = arith.constant 0 : index
      %40 = vector.load %arg6[%c0_32, %c0_33, %c0_34] : memref<1x2x1xf32, #tpu.memory_space<vmem>>, vector<1x2x1xf32>
      tpu.vector_store %arg6[%c0_32, %c0_33, %c0_34], %39 {strides = array<i32>} : memref<1x2x1xf32, #tpu.memory_space<vmem>>, vector<1x2x1xf32>,
      %cst_35 = arith.constant 0.000000e+00 : f32
      %41 = vector.broadcast %cst_35 : f32 to vector<1x2x1xf32>
      %c0_36 = arith.constant 0 : index
      %c0_37 = arith.constant 0 : index
      %c0_38 = arith.constant 0 : index
      %42 = vector.load %arg7[%c0_36, %c0_37, %c0_38] : memref<1x2x1xf32, #tpu.memory_space<vmem>>, vector<1x2x1xf32>
      tpu.vector_store %arg7[%c0_36, %c0_37, %c0_38], %41 {strides = array<i32>} : memref<1x2x1xf32, #tpu.memory_space<vmem>>, vector<1x2x1xf32>,
    } else {
    }
    %c0 = arith.constant 0 : index
    %c0_1 = arith.constant 0 : index
    %3 = vector.load %arg3[%c0, %c0_1] : memref<2x128xf32, #tpu.memory_space<vmem>>, vector<2x128xf32>
    %c0_2 = arith.constant 0 : index
    %c0_3 = arith.constant 0 : index
    %4 = vector.load %arg4[%c0_2, %c0_3] : memref<2x128xf32, #tpu.memory_space<vmem>>, vector<2x128xf32>
    %cst = arith.constant 5.000000e-01 : f32
    %5 = vector.broadcast %cst : f32 to vector<2x128xf32>
    %6 = arith.mulf %5, %3 : vector<2x128xf32>
    %7 = math.tanh %6 : vector<2x128xf32>
    %cst_4 = arith.constant 5.000000e-01 : f32
    %8 = vector.broadcast %cst_4 : f32 to vector<2x128xf32>
    %9 = arith.mulf %8, %7 : vector<2x128xf32>
    %cst_5 = arith.constant 5.000000e-01 : f32
    %10 = vector.broadcast %cst_5 : f32 to vector<2x128xf32>
    %11 = arith.addf %9, %10 : vector<2x128xf32>
    %c0_6 = arith.constant 0 : index
    %c0_7 = arith.constant 0 : index
    %c0_8 = arith.constant 0 : index
    %12 = vector.load %arg5[%c0_6, %c0_7, %c0_8] : memref<1x2x1xf32, #tpu.memory_space<vmem>>, vector<1x2x1xf32>
    %13 = vector.shape_cast %12 : vector<1x2x1xf32> to vector<2x1xf32>
    %14 = arith.mulf %11, %4 : vector<2x128xf32>
    %cst_9 = arith.constant dense<0.000000e+00> : vector<2xf32>
    %15 = vector.multi_reduction <add>, %14, %cst_9 [1] : vector<2x128xf32> to vector<2xf32>
    %16 = vector.shape_cast %15 : vector<2xf32> to vector<2x1xf32>
    %17 = arith.addf %13, %16 : vector<2x1xf32>
    %c0_10 = arith.constant 0 : index
    %c0_11 = arith.constant 0 : index
    %c0_12 = arith.constant 0 : index
    %18 = vector.load %arg5[%c0_10, %c0_11, %c0_12] : memref<1x2x1xf32, #tpu.memory_space<vmem>>, vector<1x2x1xf32>
    %19 = vector.shape_cast %18 : vector<1x2x1xf32> to vector<2x1xf32>
    %20 = vector.shape_cast %17 : vector<2x1xf32> to vector<1x2x1xf32>
    tpu.vector_store %arg5[%c0_10, %c0_11, %c0_12], %20 {strides = array<i32>} : memref<1x2x1xf32, #tpu.memory_space<vmem>>, vector<1x2x1xf32>,
    %c0_13 = arith.constant 0 : index
    %c0_14 = arith.constant 0 : index
    %c0_15 = arith.constant 0 : index
    %21 = vector.load %arg6[%c0_13, %c0_14, %c0_15] : memref<1x2x1xf32, #tpu.memory_space<vmem>>, vector<1x2x1xf32>
    %22 = vector.shape_cast %21 : vector<1x2x1xf32> to vector<2x1xf32>
    %cst_16 = arith.constant dense<0.000000e+00> : vector<2xf32>
    %23 = vector.multi_reduction <add>, %11, %cst_16 [1] : vector<2x128xf32> to vector<2xf32>
    %24 = vector.shape_cast %23 : vector<2xf32> to vector<2x1xf32>
    %25 = arith.addf %22, %24 : vector<2x1xf32>
    %c0_17 = arith.constant 0 : index
    %c0_18 = arith.constant 0 : index
    %c0_19 = arith.constant 0 : index
    %26 = vector.load %arg6[%c0_17, %c0_18, %c0_19] : memref<1x2x1xf32, #tpu.memory_space<vmem>>, vector<1x2x1xf32>
    %27 = vector.shape_cast %26 : vector<1x2x1xf32> to vector<2x1xf32>
    %28 = vector.shape_cast %25 : vector<2x1xf32> to vector<1x2x1xf32>
    tpu.vector_store %arg6[%c0_17, %c0_18, %c0_19], %28 {strides = array<i32>} : memref<1x2x1xf32, #tpu.memory_space<vmem>>, vector<1x2x1xf32>,
    %c0_20 = arith.constant 0 : index
    %c0_21 = arith.constant 0 : index
    %c0_22 = arith.constant 0 : index
    %29 = vector.load %arg7[%c0_20, %c0_21, %c0_22] : memref<1x2x1xf32, #tpu.memory_space<vmem>>, vector<1x2x1xf32>
    %30 = vector.shape_cast %29 : vector<1x2x1xf32> to vector<2x1xf32>
    %cst_23 = arith.constant dense<0.000000e+00> : vector<2xf32>
    %31 = vector.multi_reduction <add>, %4, %cst_23 [1] : vector<2x128xf32> to vector<2xf32>
    %32 = vector.shape_cast %31 : vector<2xf32> to vector<2x1xf32>
    %33 = arith.addf %30, %32 : vector<2x1xf32>
    %c0_24 = arith.constant 0 : index
    %c0_25 = arith.constant 0 : index
    %c0_26 = arith.constant 0 : index
    %34 = vector.load %arg7[%c0_24, %c0_25, %c0_26] : memref<1x2x1xf32, #tpu.memory_space<vmem>>, vector<1x2x1xf32>
    %35 = vector.shape_cast %34 : vector<1x2x1xf32> to vector<2x1xf32>
    %36 = vector.shape_cast %33 : vector<2x1xf32> to vector<1x2x1xf32>
    tpu.vector_store %arg7[%c0_24, %c0_25, %c0_26], %36 {strides = array<i32>} : memref<1x2x1xf32, #tpu.memory_space<vmem>>, vector<1x2x1xf32>,
    return
  }
  func.func @transform_0(%arg0: i32, %arg1: i32, %arg2: i32) -> (i32, i32) {
    %c1_i32 = arith.constant 1 : i32
    %0 = arith.muli %arg0, %c1_i32 : i32
    %1 = arith.addi %0, %arg2 : i32
    %c0_i32 = arith.constant 0 : i32
    return %arg1, %1 : i32, i32
  }
  func.func @transform_1(%arg0: i32, %arg1: i32, %arg2: i32) -> (i32, i32) {
    %c1_i32 = arith.constant 1 : i32
    %0 = arith.muli %arg0, %c1_i32 : i32
    %1 = arith.addi %0, %arg2 : i32
    %c0_i32 = arith.constant 0 : i32
    return %arg1, %1 : i32, i32
  }
  func.func @transform_2(%arg0: i32, %arg1: i32, %arg2: i32) -> (i32, i32, i32) {
    %c0_i32 = arith.constant 0 : i32
    %c0_i32_0 = arith.constant 0 : i32
    return %arg0, %arg1, %c0_i32 : i32, i32, i32
  }
  func.func @transform_3(%arg0: i32, %arg1: i32, %arg2: i32) -> (i32, i32, i32) {
    %c0_i32 = arith.constant 0 : i32
    %c0_i32_0 = arith.constant 0 : i32
    return %arg0, %arg1, %c0_i32 : i32, i32, i32
  }
  func.func @transform_4(%arg0: i32, %arg1: i32, %arg2: i32) -> (i32, i32, i32) {
    %c0_i32 = arith.constant 0 : i32
    %c0_i32_0 = arith.constant 0 : i32
    return %arg0, %arg1, %c0_i32 : i32, i32, i32
  }
}

</mosaic_0001>

<bundles_post_ra>
// kernel: tpu_custom_call.1
= control target key start
LH: loop header
LB: loop body
LE: loop exit
PB: predicated region body
PF: predicated region fallthrough
CT: control target
= control target key end

     0   :  { %10 = vsyncpa [#allocation3], 0  ;;  %s894_s0 = inlined_call_operand.hbm [shape: f32[2,256], index: 0, kind: input, shape index: {}]   ;;  %s895_s1 = inlined_call_operand.hbm [shape: f32[2,256], index: 1, kind: input, shape index: {}]   ;;  %s896_s2 = inlined_call_operand.vmem [shape: f32[2,2,1], index: 2, kind: output, shape index: {0}]   ;;  %s897_s3 = inlined_call_operand.vmem [shape: f32[2,2,1], index: 3, kind: output, shape index: {1}]   ;;  %s898_s4 = inlined_call_operand.vmem [shape: f32[2,2,1], index: 4, kind: output, shape index: {2}]  }
   0x1   :  { %12 = vsyncpa [#allocation3 + $0x1], 0 }
   0x2   :  { %13 = vsyncpa [#allocation5], 0 }
   0x3   :  { %15 = vsyncpa [#allocation5 + $0x1], 0  ;;  %s787_s15 = smov 0   ;;  %s789_s16 = smov 0  }
   0x4   :  { %s791_s17 = smov 0   ;;  %s793_s18 = smov 0  }
   0x5   :  { %s795_s19 = smov 0   ;;  %s797_s20 = smov 0  }
   0x6 LB: > { %s566_s21 = sadd.s32 4294967295, %s759_s20   ;;  %s40_s22 = sadd.s32 1, %s755_s19  ;;  %s759_s20 = sphi %s797_s20, %s21_s20   ;;  %s755_s19 = sphi %s795_s19, %s905_s19   ;;  %s751_s18 = sphi %s793_s18, %s904_s18   ;;  %s747_s17 = sphi %s791_s17, %s903_s17   ;;  %s743_s16 = sphi %s789_s16, %s902_s16   ;;  %s739_s15 = sphi %s787_s15, %s901_s15  }
   0x7   : > { %p42_p0 = scmp.ge.s32.totalorder %s40_s22, 2  ;;  %s51_s23 = sadd.s32 1, %s747_s17 }
   0x8   : > { %p58_p1 = scmp.ne.s32.totalorder %s747_s17, %s743_s16  ;;  %p59_p2 = scmp.eq.s32.totalorder %s759_s20, 0 }
   0x9   : > { %s907_s22 = smov (%p42_p0, %s40_s22), 0  ;;  %p64_p4 = scmp.ne.s32.totalorder %s743_s16, %s739_s15 }
   0xa   : > { %p823_p3 = por %p59_p2, %p58_p1  ;;  %s47_s25 = ssub.s32 %s755_s19, %s907_s22 }
   0xb   : > { %p65_p5 = scmp.eq.s32.totalorder %s566_s21, 0  ;;  %p49_p6 = scmp.eq.s32.totalorder %s47_s25, 0 }
   0xc   : > { %p593_p8 = scmp.lt.s32.totalorder %s759_s20, 2  ;;  %s202_s28 = sand.u32 1, %s747_s17  }
   0xd   : > { %p830_p7 = por %p65_p5, %p64_p4  ;;  %s571_s29 = sshll.u32 %s755_s19, 1 }
   0xe   : > { %s836_s27 = scalar_select %p49_p6, %s747_s17, %s51_s23  }
   0xf   : > { %s570_s30 = sshll.u32 %s202_s28, 1  ;;  %s213_s7 = scalar_lea.hbm %s894_s0, %s571_s29 }
  0x10   : > { %s215_s8 = sshll.u32 %s213_s7, 4  ;;  %s206_s9 = scalar_lea.vmem [#allocation2], %s570_s30  ;;  %s216_s8 = int_to_ptr.hbm [resolvable:$true] %s215_s8 }
  0x11   : > { %s217_s10 = sshll.u32 %s206_s9, 4  ;;  %p587_p9 = pnand %p593_p8, %p823_p3  ;;  %s218_s10 = int_to_ptr.vmem [resolvable:$true] %s217_s10 }
  0x12   : > { %p574_p10 = scmp.ge.s32.totalorder %s759_s20, 1  ;;  %p244_p11 = scmp.lt.s32.totalorder %s759_s20, 3 }
  0x13   : > { %s203_s11 = scalar_lea.sflag [#allocation3], %s202_s28  ;;  %s235_s14 = scalar_lea.hbm %s895_s1, %s571_s29 }
  0x14   : > { %589 = dma.hbm_to_vmem [thread:$0]  (!%p587_p9), %s216_s8, 32, %s218_s10, %s203_s11  }
  0x15   : > { %p245_p12 = pnand %p574_p10, %p244_p11  ;;  %s237_s15 = sshll.u32 %s235_s14, 4  ;;  %s238_s15 = int_to_ptr.hbm [resolvable:$true] %s237_s15 }
  0x16   : > { %s228_s21 = scalar_lea.vmem [#allocation4], %s570_s30  ;;  %s225_s25 = scalar_lea.sflag [#allocation5], %s202_s28 }
  0x17   : > { %s239_s23 = sshll.u32 %s228_s21, 4  ;;  %248 = sbr.rel (%p245_p12) target bundleno = 175 (0xaf), region = 28  ;;  %s240_s23 = int_to_ptr.vmem [resolvable:$true] %s239_s23 }
  0x18   : > { %592 = dma.hbm_to_vmem [thread:$0]  (!%p587_p9), %s238_s15, 32, %s240_s23, %s225_s25  }
  0x19   : > { %s250_s24 = sand.u32 (!%p245_p12), 1, %s743_s16  }
  0x1a   : > { %s575_s5 = sshll.u32 (!%p245_p12), %s250_s24, 1  ;;  %s251_s6 = scalar_lea.sflag (!%p245_p12), [#allocation3], %s250_s24 }
  0x1b   : > { %s254_s7 = scalar_lea.vmem (!%p245_p12), [#allocation2], %s575_s5 }
  0x1c   : > { %730 = dma.done.wait (%p830_p7), %s251_s6, 32  }
  0x1d   : > { %732 = vsyncadd (%p830_p7), %s251_s6, 4294967264  ;;  %s261_s29 = scalar_lea.sflag [#allocation5], %s250_s24  ;;  %s264_s30 = scalar_lea.vmem [#allocation4], %s575_s5 }
  0x1e   : > { %734 = dma.done.wait (%p830_p7), %s261_s29, 32  }
  0x1f   : > { %736 = vsyncadd (%p830_p7), %s261_s29, 4294967264  ;;  %p313_p13 = scmp.lt.s32.totalorder %s751_s18, 1  ;;  %vm338_vm0 = vcmask 1024   ;;  %v761_v0 = vmov 0.0   ;;  %v342_v1 = vld [vmem:[%s254_s7] sm:$0x3] }
  0x20   : > { %v343_v2 = vld [vmem:[%s264_s30] sm:$0x3]  ;;  %vm350_vm1 = vcmask 1041408   ;;  %v344_v3 = vmul.f32 0.5, %v342_v1 }
  0x21   : > { %s909_s18 = smov (!%p313_p13, %s751_s18), 1  ;;  %v364_v4 = vsel %vm350_vm1, %v343_v2, 0.0 }
  0x22   : > { %s577_s28 = sshll.u32 %s909_s18, 1  ;;  %365 = vadd.xlane.f32.xlu1 %v364_v4  ;;  %643 = vtanh.f32 %v344_v3 }
  0x23   : > { %s319_s10 = scalar_lea.vmem %s896_s2, %s577_s28  ;;  %s333_s12 = scalar_lea.vmem %s898_s4, %s577_s28 }
  0x24   : > { %339 = vst.msk [vmem:[%s319_s10] sm:$0x3] %vm338_vm0, %v761_v0  ;;  %s326_s14 = scalar_lea.vmem %s897_s3, %s577_s28 }
  0x25   : > { %341 = vst.msk [vmem:[%s333_s12] sm:$0x3] %vm338_vm0, %v761_v0 }
  0x26   : > { %340 = vst.msk [vmem:[%s326_s14] sm:$0x3] %vm338_vm0, %v761_v0 }
  0x28   : > { %v644_v5 = vpop.eup %643 }
  0x29   : > { %v346_v6 = vmul.f32 0.5, %v644_v5 }
  0x2b   : > { %v347_v7 = vadd.f32 0.5, %v346_v6  ;;  %v348_v14 = vld [vmem:[%s319_s10] sm:$0x3] }
  0x2c   : > { %v363_v11 = vld [vmem:[%s333_s12] sm:$0x3] }
  0x2d   : > { %v349_v8 = vmul.f32 %v347_v7, %v343_v2  ;;  %v358_v10 = vsel %vm350_vm1, %v347_v7, 0.0  ;;  %v357_v17 = vld [vmem:[%s326_s14] sm:$0x3] }
  0x2f   : > { %v351_v9 = vsel %vm350_vm1, %v349_v8, 0.0 }
  0x30   : > { %352 = vadd.xlane.f32.xlu0 %v351_v9 }
  0x38   : > { %359 = vadd.xlane.f32.xlu0 %v358_v10 }
  0x95   : > { %v366_v12 = vpop.xlane.xlu1 %365 }
  0x96   : > { %v367_v13 = vadd.f32 %v366_v12, %v363_v11 }
  0x98   : > { %368 = vst.msk [vmem:[%s333_s12] sm:$0x3] %vm338_vm0, %v367_v13 }
  0xa3   : > { %v353_v15 = vpop.xlane.xlu0 %352 }
  0xa4   : > { %v354_v16 = vadd.f32 %v353_v15, %v348_v14 }
  0xa6   : > { %356 = vst.msk [vmem:[%s319_s10] sm:$0x3] %vm338_vm0, %v354_v16 }
  0xab   : > { %v360_v18 = vpop.xlane.xlu0 %359 }
  0xac   : > { %v361_v19 = vadd.f32 %v360_v18, %v357_v17 }
  0xae   : > { %362 = vst.msk [vmem:[%s326_s14] sm:$0x3] %vm338_vm0, %v361_v19 }
  0xaf PF: > { %s21_s20 = sadd.s32 1, %s759_s20   ;;  %s901_s15 = smov %s743_s16 }
  0xb0   : > { %p18_p0 = scmp.ge.s32.totalorder %s21_s20, 4   ;;  %s902_s16 = smov %s747_s17 }
  0xb1   : > { %s903_s17 = smov %s836_s27  ;;  %s904_s18 = smov %s755_s19 }
  0xb2   : > { %s905_s19 = smov %s907_s22  ;;  %20 = sbr.rel (!%p18_p0) target bundleno = 6 (0x6), region = 109 }
  0xb7   :  { %434 = vsyncpa [#allocation3], 1 }
  0xb8   :  { %436 = vsyncpa [#allocation3 + $0x1], 1 }
  0xb9   :  { %437 = vsyncpa [#allocation5], 1 }
  0xba   :  { %439 = vsyncpa [#allocation5 + $0x1], 1 }

</bundles_post_ra>
